<compile_context>
chip_gen: v7x
topology: tpu7x:2x2x1
jax: 0.10.0
libtpu: 0.0.40
codegen_flags: <defaults>
</compile_context>

<pallas_src>
import jax
import jax.numpy as jnp
from jax.experimental import pallas as pl
from jax.experimental.pallas import tpu as pltpu


def _round_up(x, m):
    return ((x + m - 1) // m) * m


_MAX_TB = 1024  # rows (lanes) per grid step; 512-1024+ reaches ~85% of HBM roofline


def _choose_tile(batch):
    """Pick (tile_batch, num_blocks). tile_batch is a multiple of 128 (lane axis);
    num_blocks is even when >1 so v7x's 2 TensorCores split the parallel axis evenly."""
    if batch <= 128:
        return 128, 1
    tb = min(_MAX_TB, _round_up(-(-batch // 2), 128))   # aim for >= 2 lane-aligned blocks
    num_blocks = -(-batch // tb)
    if num_blocks > 1 and num_blocks % 2:
        num_blocks += 1                                  # even parallel axis for megacore
    return tb, num_blocks


def _mlp_kernel(xt_ref, w1t_ref, b1t_ref, w2t_ref, b2t_ref, ot_ref):
    # xt_ref : (obs_dim, TB)      batch is lane-dense
    # w1t_ref: (HID_P, obs_dim)   b1t_ref: (HID_P, 1)
    # w2t_ref: (ACT, HID_P)       b2t_ref: (ACT, 1)
    # ot_ref : (ACT, TB)          lane-dense, narrow output
    xt = xt_ref[...].astype(jnp.float32)
    w1t = w1t_ref[...].astype(jnp.float32)
    obs_dim = xt.shape[0]

    # fc1 on the VPU: K = obs_dim (4) is tiny, so obs_dim outer-product FMAs beat an MXU
    # round-trip. xt[k] is already lane-dense over batch (stride-0 sublane broadcast);
    # W1^T[:, k] is a one-time lane broadcast per k.
    h = b1t_ref[...].astype(jnp.float32) + w1t[:, 0:1] * xt[0:1, :]
    for k in range(1, obs_dim):                        # static, fully unrolled
        h = h + w1t[:, k:k + 1] * xt[k:k + 1, :]
    h = jnp.maximum(h, 0.0)                            # (HID_P, TB)

    # fc2 on the MXU: (ACT, HID_P) @ (HID_P, TB), f32 accumulation.
    out = jnp.dot(w2t_ref[...].astype(jnp.float32), h,
                  preferred_element_type=jnp.float32)
    out = out + b2t_ref[...].astype(jnp.float32)
    ot_ref[...] = out.astype(ot_ref.dtype)             # unmasked lane-dense store


def prepare_params(w1, b1, w2, b2):
    """Pad hidden (100 -> 128) and transpose weights to the kernel's feature-major layout.
    Call ONCE (e.g. at module construction / after each weight update), not per forward."""
    obs_dim, hidden = w1.shape
    action_dim = w2.shape[-1]
    hid_p = _round_up(hidden, 128)
    dtype = w1.dtype
    w1t = jnp.zeros((hid_p, obs_dim), dtype).at[:hidden, :].set(w1.T)
    b1t = jnp.zeros((hid_p, 1), dtype).at[:hidden, 0].set(b1.reshape(-1))
    w2t = jnp.zeros((action_dim, hid_p), dtype).at[:, :hidden].set(w2.T)
    b2t = b2.reshape(action_dim, 1)
    return w1t, b1t, w2t, b2t


@jax.jit
def feed_forward_cartpole(x, params):
    """Pallas implementation of FeedForwardCartPole.forward.

    x      : (batch, obs_dim) or (obs_dim,)  -- unsqueezed like the PyTorch module.
    params : output of prepare_params(w1, b1, w2, b2) with w1:(obs,hid), w2:(hid,act)
             (i.e. (in_features, out_features) -- transposed vs. nn.Linear storage).
    Returns (batch, action_dim).
    """
    w1t, b1t, w2t, b2t = params
    if x.ndim < 2:
        x = x[None, :]

    batch, obs_dim = x.shape
    hid_p = w1t.shape[0]
    action_dim = w2t.shape[0]
    dtype = x.dtype

    tb, num_blocks = _choose_tile(batch)
    padded_batch = tb * num_blocks

    # Feature-major, batch-padded input: (obs_dim, padded_batch), batch lane-dense.
    xt = jnp.zeros((obs_dim, padded_batch), dtype).at[:, :batch].set(x.T)

    itemsize = jnp.dtype(dtype).itemsize
    flops = 2 * padded_batch * hid_p * (obs_dim + action_dim)
    bytes_accessed = itemsize * (padded_batch * (obs_dim + action_dim)
                                 + hid_p * (obs_dim + action_dim + 1) + action_dim)

    out_t = pl.pallas_call(
        _mlp_kernel,
        out_shape=jax.ShapeDtypeStruct((action_dim, padded_batch), dtype),
        grid=(num_blocks,),
        in_specs=[
            pl.BlockSpec((obs_dim, tb), lambda i: (0, i)),        # x^T: tiled over batch
            pl.BlockSpec((hid_p, obs_dim), lambda i: (0, 0)),     # W1^T: VMEM-resident
            pl.BlockSpec((hid_p, 1), lambda i: (0, 0)),           # b1
            pl.BlockSpec((action_dim, hid_p), lambda i: (0, 0)),  # W2^T: VMEM-resident
            pl.BlockSpec((action_dim, 1), lambda i: (0, 0)),      # b2
        ],
        out_specs=pl.BlockSpec((action_dim, tb), lambda i: (0, i)),
        compiler_params=pltpu.CompilerParams(
            dimension_semantics=("parallel",),                     # even split on v7x's 2 TCs
        ),
        cost_estimate=pl.CostEstimate(
            flops=flops, transcendentals=0, bytes_accessed=bytes_accessed),
    )(xt, w1t, b1t, w2t, b2t)

    # Slice away batch padding; return module-convention (batch, action_dim).
    return out_t[:, :batch].T


def init_params(key, obs_dim, hidden, action_dim, dtype=jnp.float32):
    """Deterministic init matching nn.Linear's default U(-1/sqrt(fan_in), +1/sqrt(fan_in))."""
    k1, k2, k3, k4 = jax.random.split(key, 4)
    bound1 = 1.0 / jnp.sqrt(jnp.array(obs_dim, dtype))
    bound2 = 1.0 / jnp.sqrt(jnp.array(hidden, dtype))
    w1 = jax.random.uniform(k1, (obs_dim, hidden), dtype, -bound1, bound1)
    b1 = jax.random.uniform(k2, (hidden,), dtype, -bound1, bound1)
    w2 = jax.random.uniform(k3, (hidden, action_dim), dtype, -bound2, bound2)
    b2 = jax.random.uniform(k4, (action_dim,), dtype, -bound2, bound2)
    return w1, b1, w2, b2


if __name__ == "__main__":
    # CartPole-like dims from the module: obs_dim=4, hidden=100, action_dim=2.
    OBS_DIM, HIDDEN, ACTION_DIM, BATCH = 4, 100, 2, 8

    key = jax.random.PRNGKey(0)
    kx, kp = jax.random.split(key)
    x = jax.random.normal(kx, (BATCH, OBS_DIM), jnp.float32)
    w1, b1, w2, b2 = init_params(kp, OBS_DIM, HIDDEN, ACTION_DIM)
    params = prepare_params(w1, b1, w2, b2)        # pad/transpose ONCE, outside the hot path

    out = jax.block_until_ready(feed_forward_cartpole(x, params))

    # Pure-JAX reference (same math as the PyTorch forward).
    ref = jnp.maximum(x @ w1 + b1, 0.0) @ w2 + b2
    assert out.shape == (BATCH, ACTION_DIM), out.shape
    assert jnp.allclose(out, ref, atol=1e-5, rtol=1e-5), "mismatch vs reference"

    # 1-D (unsqueeze) path.
    out1d = jax.block_until_ready(feed_forward_cartpole(x[0], params))
    assert out1d.shape == (1, ACTION_DIM)
    assert jnp.allclose(out1d, ref[0:1], atol=1e-5, rtol=1e-5)

    # Larger batch: 2 even 384-row blocks (both v7x TensorCores usable).
    xL = jax.random.normal(kx, (600, OBS_DIM), jnp.float32)
    outL = jax.block_until_ready(feed_forward_cartpole(xL, params))
    refL = jnp.maximum(xL @ w1 + b1, 0.0) @ w2 + b2
    assert outL.shape == (600, ACTION_DIM)
    assert jnp.allclose(outL, refL, atol=1e-4, rtol=1e-4), "mismatch vs reference (large batch)"

    print("KERNEL_OK")
</pallas_src>

<mosaic_0001>
module attributes {stable_mosaic.version = 11 : i64} {
  func.func @_mlp_kernel(%arg0: i32, %arg1: memref<4x128xf32, #tpu.memory_space<vmem>>, %arg2: memref<128x4xf32, #tpu.memory_space<vmem>>, %arg3: memref<128x1xf32, #tpu.memory_space<vmem>>, %arg4: memref<2x128xf32, #tpu.memory_space<vmem>>, %arg5: memref<2x1xf32, #tpu.memory_space<vmem>>, %arg6: memref<2x128xf32, #tpu.memory_space<vmem>>) attributes {dimension_semantics = [#tpu.dimension_semantics<parallel>], iteration_bounds = array<i64: 1>, scalar_prefetch = 0 : i64, scratch_operands = 0 : i64, tpu.core_type = #tpu.core_type<tc>, window_params = [{transform_indices = @transform_0, window_bounds = array<i64: 4, 128>}, {pipeline_mode = #tpu.pipeline_mode<synchronous>, transform_indices = @transform_1, window_bounds = array<i64: 128, 4>}, {pipeline_mode = #tpu.pipeline_mode<synchronous>, transform_indices = @transform_2, window_bounds = array<i64: 128, 1>}, {pipeline_mode = #tpu.pipeline_mode<synchronous>, transform_indices = @transform_3, window_bounds = array<i64: 2, 128>}, {pipeline_mode = #tpu.pipeline_mode<synchronous>, transform_indices = @transform_4, window_bounds = array<i64: 2, 1>}, {transform_indices = @transform_5, window_bounds = array<i64: 2, 128>}]} {
    %c0 = arith.constant 0 : index
    %c0_0 = arith.constant 0 : index
    %0 = vector.load %arg1[%c0, %c0_0] : memref<4x128xf32, #tpu.memory_space<vmem>>, vector<4x128xf32>
    %c0_1 = arith.constant 0 : index
    %c0_2 = arith.constant 0 : index
    %1 = vector.load %arg2[%c0_1, %c0_2] : memref<128x4xf32, #tpu.memory_space<vmem>>, vector<128x4xf32>
    %c0_3 = arith.constant 0 : index
    %c0_4 = arith.constant 0 : index
    %2 = vector.load %arg3[%c0_3, %c0_4] : memref<128x1xf32, #tpu.memory_space<vmem>>, vector<128x1xf32>
    %3 = vector.extract_strided_slice %1 {offsets = [0, 0], sizes = [128, 1], strides = [1, 1]} : vector<128x4xf32> to vector<128x1xf32>
    %4 = vector.extract_strided_slice %0 {offsets = [0, 0], sizes = [1, 128], strides = [1, 1]} : vector<4x128xf32> to vector<1x128xf32>
    %5 = vector.broadcast %3 : vector<128x1xf32> to vector<128x128xf32>
    %6 = vector.broadcast %4 : vector<1x128xf32> to vector<128x128xf32>
    %7 = arith.mulf %5, %6 : vector<128x128xf32>
    %8 = vector.broadcast %2 : vector<128x1xf32> to vector<128x128xf32>
    %9 = arith.addf %8, %7 : vector<128x128xf32>
    %10 = vector.extract_strided_slice %1 {offsets = [0, 1], sizes = [128, 1], strides = [1, 1]} : vector<128x4xf32> to vector<128x1xf32>
    %11 = vector.extract_strided_slice %0 {offsets = [1, 0], sizes = [1, 128], strides = [1, 1]} : vector<4x128xf32> to vector<1x128xf32>
    %12 = vector.broadcast %10 : vector<128x1xf32> to vector<128x128xf32>
    %13 = vector.broadcast %11 : vector<1x128xf32> to vector<128x128xf32>
    %14 = arith.mulf %12, %13 : vector<128x128xf32>
    %15 = arith.addf %9, %14 : vector<128x128xf32>
    %16 = vector.extract_strided_slice %1 {offsets = [0, 2], sizes = [128, 1], strides = [1, 1]} : vector<128x4xf32> to vector<128x1xf32>
    %17 = vector.extract_strided_slice %0 {offsets = [2, 0], sizes = [1, 128], strides = [1, 1]} : vector<4x128xf32> to vector<1x128xf32>
    %18 = vector.broadcast %16 : vector<128x1xf32> to vector<128x128xf32>
    %19 = vector.broadcast %17 : vector<1x128xf32> to vector<128x128xf32>
    %20 = arith.mulf %18, %19 : vector<128x128xf32>
    %21 = arith.addf %15, %20 : vector<128x128xf32>
    %22 = vector.extract_strided_slice %1 {offsets = [0, 3], sizes = [128, 1], strides = [1, 1]} : vector<128x4xf32> to vector<128x1xf32>
    %23 = vector.extract_strided_slice %0 {offsets = [3, 0], sizes = [1, 128], strides = [1, 1]} : vector<4x128xf32> to vector<1x128xf32>
    %24 = vector.broadcast %22 : vector<128x1xf32> to vector<128x128xf32>
    %25 = vector.broadcast %23 : vector<1x128xf32> to vector<128x128xf32>
    %26 = arith.mulf %24, %25 : vector<128x128xf32>
    %27 = arith.addf %21, %26 : vector<128x128xf32>
    %cst = arith.constant 0.000000e+00 : f32
    %28 = vector.broadcast %cst : f32 to vector<128x128xf32>
    %29 = arith.maximumf %27, %28 : vector<128x128xf32>
    %c0_5 = arith.constant 0 : index
    %c0_6 = arith.constant 0 : index
    %30 = vector.load %arg4[%c0_5, %c0_6] : memref<2x128xf32, #tpu.memory_space<vmem>>, vector<2x128xf32>
    %cst_7 = arith.constant dense<0.000000e+00> : vector<2x128xf32>
    %31 = tpu.matmul %30, %29, %cst_7 {dimension_numbers = #tpu.dot_dimension_numbers<[1], [0], [0], [1], [0, 0, 1, 1], [], []>} : vector<2x128xf32>, vector<128x128xf32>, vector<2x128xf32> -> vector<2x128xf32>
    %c0_8 = arith.constant 0 : index
    %c0_9 = arith.constant 0 : index
    %32 = vector.load %arg5[%c0_8, %c0_9] : memref<2x1xf32, #tpu.memory_space<vmem>>, vector<2x1xf32>
    %33 = vector.broadcast %32 : vector<2x1xf32> to vector<2x128xf32>
    %34 = arith.addf %31, %33 : vector<2x128xf32>
    %c0_10 = arith.constant 0 : index
    %c0_11 = arith.constant 0 : index
    %35 = vector.load %arg6[%c0_10, %c0_11] : memref<2x128xf32, #tpu.memory_space<vmem>>, vector<2x128xf32>
    tpu.vector_store %arg6[%c0_10, %c0_11], %34 {strides = array<i32>} : memref<2x128xf32, #tpu.memory_space<vmem>>, vector<2x128xf32>,
    return
  }
  func.func @transform_0(%arg0: i32) -> (i32, i32) {
    %c0_i32 = arith.constant 0 : i32
    %c0_i32_0 = arith.constant 0 : i32
    return %c0_i32, %arg0 : i32, i32
  }
  func.func @transform_1(%arg0: i32) -> (i32, i32) {
    %c0_i32 = arith.constant 0 : i32
    %c0_i32_0 = arith.constant 0 : i32
    %c0_i32_1 = arith.constant 0 : i32
    return %c0_i32, %c0_i32_0 : i32, i32
  }
  func.func @transform_2(%arg0: i32) -> (i32, i32) {
    %c0_i32 = arith.constant 0 : i32
    %c0_i32_0 = arith.constant 0 : i32
    %c0_i32_1 = arith.constant 0 : i32
    return %c0_i32, %c0_i32_0 : i32, i32
  }
  func.func @transform_3(%arg0: i32) -> (i32, i32) {
    %c0_i32 = arith.constant 0 : i32
    %c0_i32_0 = arith.constant 0 : i32
    %c0_i32_1 = arith.constant 0 : i32
    return %c0_i32, %c0_i32_0 : i32, i32
  }
  func.func @transform_4(%arg0: i32) -> (i32, i32) {
    %c0_i32 = arith.constant 0 : i32
    %c0_i32_0 = arith.constant 0 : i32
    %c0_i32_1 = arith.constant 0 : i32
    return %c0_i32, %c0_i32_0 : i32, i32
  }
  func.func @transform_5(%arg0: i32) -> (i32, i32) {
    %c0_i32 = arith.constant 0 : i32
    %c0_i32_0 = arith.constant 0 : i32
    return %c0_i32, %arg0 : i32, i32
  }
}

</mosaic_0001>

<bundles_post_ra>
// kernel: feed_forward_cartpole.1
= control target key start
LH: loop header
LB: loop body
LE: loop exit
PB: predicated region body
PF: predicated region fallthrough
CT: control target
= control target key end

     0   :  { %v774_v0 = vmov 2   ;;  %v775_v1 = vmov 0   ;;  %v776_v8 = vmov 1   ;;  %v777_v16 = vmov 3   ;;  %s1202_s2 = inlined_call_operand.vmem [shape: f32[128,1], index: 2, kind: input, shape index: {}]   ;;  %s1203_s1 = inlined_call_operand.vmem [shape: f32[128,4], index: 1, kind: input, shape index: {}]   ;;  %s1204_s0 = inlined_call_operand.vmem [shape: f32[4,128], index: 0, kind: input, shape index: {}]   ;;  %s1205_s4 = inlined_call_operand.vmem [shape: f32[2,1], index: 4, kind: input, shape index: {}]   ;;  %s1206_s3 = inlined_call_operand.vmem [shape: f32[2,128], index: 3, kind: input, shape index: {}]   ;;  %s1207_s5 = inlined_call_operand.vmem [shape: f32[2,128], index: 5, kind: output, shape index: {}]  }
   0x1   :  { %738 = vset.pattern.permute.xlu0 %v774_v0  ;;  %730 = vset.pattern.permute.xlu1 %v775_v1  ;;  %v37_v2 = vld [vmem:[%s1202_s2] sm:$0xff]  ;;  %v819_v3 = vld [vmem:[%s1203_s1 + $0x10] sm:$0xff]  ;;  %v38_v4 = vld [vmem:[%s1202_s2 + $0x8] sm:$0xff]  ;;  %v778_v28 = vmov 0.0|0.0   ;;  %vm779_vm0 = vmmov 0  }
   0x2   :  { %155 = vperm.xlu1 %730, %v37_v2   ;;  %358 = vperm.xlu0 %738, %v819_v3   ;;  %v828_v5 = vld [vmem:[%s1203_s1 + $0x30] sm:$0xff]  ;;  %v839_v7 = vld [vmem:[%s1203_s1 + $0x8] sm:$0xff]  ;;  %v21_v9 = vld [vmem:[%s1203_s1] sm:$0xff]  ;;  %v133_v2 = vlaneseq }
   0x3   :  { %v834_v6 = vld [vmem:[%s1203_s1 + $0x50] sm:$0xff]  ;;  %v24_v10 = vld [vmem:[%s1203_s1 + $0x18] sm:$0xff]  ;;  %v42_v13 = vld [vmem:[%s1202_s2 + $0x28] sm:$0xff]  ;;  %699 = vmatprep.subr.bf16.mxu0 %v778_v28 }
   0x4   :  { %v39_v11 = vld [vmem:[%s1202_s2 + $0x10] sm:$0xff]  ;;  %v40_v12 = vld [vmem:[%s1202_s2 + $0x18] sm:$0xff]  ;;  %v46_v17 = vld [vmem:[%s1202_s2 + $0x48] sm:$0xff] }
   0x5   :  { %v869_v14 = vld [vmem:[%s1203_s1 + $0x38] sm:$0xff]  ;;  %v43_v15 = vld [vmem:[%s1202_s2 + $0x30] sm:$0xff]  ;;  %v25_v18 = vld [vmem:[%s1203_s1 + $0x20] sm:$0xff] }
   0x6   :  { %160 = vperm.xlu1 %730, %v38_v4   ;;  %374 = vperm.xlu0 %738, %v828_v5   ;;  %v887_v19 = vld [vmem:[%s1203_s1 + $0x58] sm:$0xff]  ;;  %v26_v20 = vld [vmem:[%s1203_s1 + $0x28] sm:$0xff]  ;;  %v47_v21 = vld [vmem:[%s1202_s2 + $0x50] sm:$0xff] }
   0x7   :  { %v50_v22 = vld [vmem:[%s1202_s2 + $0x68] sm:$0xff]  ;;  %v903_v23 = vld [vmem:[%s1203_s1 + $0x78] sm:$0xff]  ;;  %v41_v24 = vld [vmem:[%s1202_s2 + $0x20] sm:$0xff] }
   0x8   :  { %v51_v25 = vld [vmem:[%s1202_s2 + $0x70] sm:$0xff]  ;;  %v44_v27 = vld [vmem:[%s1202_s2 + $0x38] sm:$0xff]  ;;  %v29_v29 = vld [vmem:[%s1203_s1 + $0x40] sm:$0xff] }
   0x9   :  { %v924_v26 = vld [vmem:[%s1203_s1 + $0x70] sm:$0xff]  ;;  %v30_v30 = vld [vmem:[%s1203_s1 + $0x48] sm:$0xff]  ;;  %v45_v32 = vld [vmem:[%s1202_s2 + $0x40] sm:$0xff] }
   0xa   :  { %731 = vset.pattern.permute.xlu1 %v776_v8  ;;  %390 = vperm.xlu0 %738, %v834_v6   ;;  %v951_v31 = vld [vmem:[%s1203_s1 + $0x68] sm:$0xff]  ;;  %v48_v44 = vld [vmem:[%s1202_s2 + $0x58] sm:$0xff]  ;;  %v1012_v52 = vld [vmem:[%s1203_s1 + $0x60] sm:$0xff] }
   0xb   :  { %254 = vperm.xlu1 %731, %v839_v7   ;;  %v49_v59 = vld [vmem:[%s1202_s2 + $0x60] sm:$0xff] }
   0xe   :  { %759 = vset.pattern.permute.xlu0 %v775_v1 }
   0xf   :  { %732 = vset.pattern.permute.xlu1 %v775_v1  ;;  %55 = vperm.xlu0 %759, %v21_v9  }
  0x10   :  { %65 = vperm.xlu1 %732, %v819_v3  }
  0x13   :  { %60 = vperm.xlu0 %759, %v839_v7  }
  0x14   :  { %733 = vset.pattern.permute.xlu1 %v774_v0 }
  0x15   :  { %350 = vperm.xlu1 %733, %v21_v9  }
  0x17   :  { %70 = vperm.xlu0 %759, %v24_v10  }
  0x19   :  { %354 = vperm.xlu1 %733, %v839_v7  }
  0x1b   :  { %165 = vperm.xlu0 %759, %v39_v11  }
  0x1d   :  { %734 = vset.pattern.permute.xlu1 %v775_v1 }
  0x1e   :  { %170 = vperm.xlu1 %734, %v40_v12  }
  0x1f   :  { %180 = vperm.xlu0 %759, %v42_v13  }
  0x22   :  { %735 = vset.pattern.permute.xlu1 %v776_v8 }
  0x23   :  { %90 = vperm.xlu0 %759, %v869_v14   ;;  %262 = vperm.xlu1 %735, %v24_v10  }
  0x27   :  { %185 = vperm.xlu0 %759, %v43_v15   ;;  %736 = vset.pattern.permute.xlu1 %v777_v16 }
  0x28   :  { %450 = vperm.xlu1 %736, %v21_v9  }
  0x2b   :  { %200 = vperm.xlu0 %759, %v46_v17  }
  0x2c   :  { %737 = vset.pattern.permute.xlu1 %v775_v1 }
  0x2d   :  { %75 = vperm.xlu1 %737, %v25_v18  }
  0x2f   :  { %110 = vperm.xlu0 %759, %v887_v19  }
  0x31   :  { %80 = vperm.xlu1 %737, %v26_v20  }
  0x33   :  { %205 = vperm.xlu0 %759, %v47_v21  }
  0x35   :  { %739 = vset.pattern.permute.xlu1 %v774_v0 }
  0x36   :  { %362 = vperm.xlu1 %739, %v24_v10  }
  0x37   :  { %220 = vperm.xlu0 %759, %v50_v22  }
  0x3a   :  { %740 = vset.pattern.permute.xlu1 %v775_v1 }
  0x3b   :  { %130 = vperm.xlu0 %759, %v903_v23   ;;  %175 = vperm.xlu1 %740, %v41_v24  }
  0x3f   :  { %225 = vperm.xlu0 %759, %v51_v25   ;;  %741 = vset.pattern.permute.xlu1 %v776_v8 }
  0x40   :  { %266 = vperm.xlu1 %741, %v25_v18  }
  0x43   :  { %766 = vset.pattern.permute.xlu0 %v776_v8 }
  0x44   :  { %250 = vperm.xlu0 %766, %v21_v9   ;;  %270 = vperm.xlu1 %741, %v26_v20  }
  0x48   :  { %258 = vperm.xlu0 %766, %v819_v3   ;;  %742 = vset.pattern.permute.xlu1 %v777_v16 }
  0x49   :  { %462 = vperm.xlu1 %742, %v24_v10   ;;  %v20_v10 = vld [vmem:[%s1204_s0] sm:$0xf] }
  0x4c   :  { %274 = vperm.xlu0 %766, %v828_v5  }
  0x4d   :  { %743 = vset.pattern.permute.xlu1 %v775_v1 }
  0x4e   :  { %85 = vperm.xlu1 %743, %v828_v5  }
  0x50   :  { %290 = vperm.xlu0 %766, %v834_v6  }
  0x52   :  { %744 = vset.pattern.permute.xlu1 %v774_v0 }
  0x53   :  { %366 = vperm.xlu1 %744, %v25_v18  }
  0x54   :  { %306 = vperm.xlu0 %766, %v924_v26  }
  0x57   :  { %370 = vperm.xlu1 %744, %v26_v20  }
  0x58   :  { %768 = vset.pattern.permute.xlu0 %v777_v16 }
  0x59   :  { %454 = vperm.xlu0 %768, %v839_v7  }
  0x5b   :  { %745 = vset.pattern.permute.xlu1 %v775_v1 }
  0x5c   :  { %190 = vperm.xlu1 %745, %v44_v27  }
  0x5d   :  { %458 = vperm.xlu0 %768, %v819_v3  }
  0x60   :  { %746 = vset.pattern.permute.xlu1 %v776_v8 }
  0x61   :  { %470 = vperm.xlu0 %768, %v26_v20   ;;  %278 = vperm.xlu1 %746, %v869_v14  }
  0x65   :  { %474 = vperm.xlu0 %768, %v828_v5   ;;  %747 = vset.pattern.permute.xlu1 %v777_v16  ;;  %v134_v5 = vshrl.u32 %v133_v2, 7 }
  0x66   :  { %466 = vperm.xlu1 %747, %v25_v18  }
  0x67   :  { %v315_v11 = vsub.s32 1, %v134_v5  ;;  %v415_v15 = vsub.s32 2, %v134_v5 }
  0x69   :  { %486 = vperm.xlu0 %768, %v30_v30   ;;  %v1059_v17 = vrot.slane %v20_v10, %v315_v11  ;;  %v1064_v22 = vrot.slane %v20_v10, %v415_v15 }
  0x6a   :  { %748 = vset.pattern.permute.xlu1 %v775_v1 }
  0x6b   :  { %95 = vperm.xlu1 %748, %v29_v29  }
  0x6d   :  { %490 = vperm.xlu0 %768, %v834_v6  }
  0x6f   :  { %100 = vperm.xlu1 %748, %v30_v30  }
  0x71   :  { %502 = vperm.xlu0 %768, %v951_v31  }
  0x73   :  { %749 = vset.pattern.permute.xlu1 %v774_v0 }
  0x74   :  { %378 = vperm.xlu1 %749, %v869_v14  }
  0x75   :  { %506 = vperm.xlu0 %768, %v924_v26  }
  0x78   :  { %750 = vset.pattern.permute.xlu1 %v775_v1 }
  0x79   :  { %195 = vperm.xlu1 %750, %v45_v32   ;;  %773 = vset.pattern.permute.xlu0 %v775_v1 }
  0x7d   :  { %751 = vset.pattern.permute.xlu1 %v776_v8 }
  0x7e   :  { %282 = vperm.xlu1 %751, %v29_v29  }
  0x81   :  { %v963_v33 = vpop.permute.xlu1 %155  ;;  %v965_v34 = vpop.permute.xlu0 %358 }
  0x82   :  { %286 = vperm.xlu1 %751, %v30_v30  }
  0x85   :  { %v967_v35 = vpop.permute.xlu1 %160  ;;  %v969_v36 = vpop.permute.xlu0 %374 }
  0x86   :  { %752 = vset.pattern.permute.xlu1 %v777_v16 }
  0x87   :  { %478 = vperm.xlu1 %752, %v869_v14  }
  0x89   :  { %v973_v37 = vpop.permute.xlu0 %390 }
  0x8a   :  { %v975_v38 = vpop.permute.xlu1 %254 }
  0x8b   :  { %753 = vset.pattern.permute.xlu1 %v775_v1 }
  0x8c   :  { %105 = vperm.xlu1 %753, %v834_v6   ;;  %v135_v6 = vsub.s32 0, %v134_v5 }
  0x8e   :  { %v979_v39 = vpop.permute.xlu0 %55  ;;  %v1055_v12 = vrot.slane %v20_v10, %v135_v6 }
  0x8f   :  { %v981_v40 = vpop.permute.xlu1 %65 }
  0x90   :  { %754 = vset.pattern.permute.xlu1 %v774_v0  ;;  %v137_v18 = vmul.f32 %v1055_v12, %v979_v39  ;;  %v423_v39 = vmul.f32 %v1064_v22, %v969_v36  ;;  %v318_v36 = vmul.f32 %v1059_v17, %v975_v38 }
  0x91   :  { %382 = vperm.xlu1 %754, %v29_v29  }
  0x92   :  { %v984_v41 = vpop.permute.xlu0 %60  ;;  %v233_v27 = vadd.f32 %v963_v33, %v137_v18 }
  0x94   :  { %v986_v42 = vpop.permute.xlu1 %350 }
  0x95   :  { %386 = vperm.xlu1 %754, %v30_v30   ;;  %v515_v30 = vsub.s32 3, %v134_v5 }
  0x96   :  { %v988_v43 = vpop.permute.xlu0 %70 }
  0x97   :  { %v140_v2 = vmul.f32 %v1055_v12, %v988_v43  ;;  %v1082_v5 = vrot.slane %v20_v10, %v515_v30 }
  0x98   :  { %v993_v45 = vpop.permute.xlu1 %354 }
  0x99   :  { %755 = vset.pattern.permute.xlu1 %v775_v1 }
  0x9a   :  { %v996_v46 = vpop.permute.xlu0 %165  ;;  %210 = vperm.xlu1 %755, %v48_v44  }
  0x9d   :  { %v998_v47 = vpop.permute.xlu1 %170 }
  0x9e   :  { %756 = vset.pattern.permute.xlu1 %v776_v8  ;;  %v1001_v48 = vpop.permute.xlu0 %180  ;;  %v236_v38 = vadd.f32 %v998_v47, %v140_v2 }
  0x9f   :  { %294 = vperm.xlu1 %756, %v887_v19  }
  0xa2   :  { %v1004_v49 = vpop.permute.xlu1 %262  ;;  %v1006_v50 = vpop.permute.xlu0 %90 }
  0xa3   :  { %757 = vset.pattern.permute.xlu1 %v777_v16 }
  0xa4   :  { %482 = vperm.xlu1 %757, %v29_v29   ;;  %v138_v29 = vmul.f32 %v1055_v12, %v984_v41  ;;  %v417_v41 = vmul.f32 %v1064_v22, %v986_v42  ;;  %v418_v42 = vmul.f32 %v1064_v22, %v993_v45  ;;  %v419_v45 = vmul.f32 %v1064_v22, %v965_v34 }
  0xa6   :  { %v186_v51 = vpop.permute.xlu0 %185  ;;  %v234_v33 = vadd.f32 %v967_v35, %v138_v29  ;;  %v139_v35 = vmul.f32 %v1055_v12, %v981_v40 }
  0xa7   :  { %v1014_v53 = vpop.permute.xlu1 %450 }
  0xa8   :  { %758 = vset.pattern.permute.xlu1 %v775_v1  ;;  %v517_v40 = vmul.f32 %v1082_v5, %v1014_v53 }
  0xa9   :  { %115 = vperm.xlu1 %758, %v1012_v52  }
  0xaa   :  { %v1018_v54 = vpop.permute.xlu0 %200 }
  0xac   :  { %v1020_v55 = vpop.permute.xlu1 %75 }
  0xad   :  { %120 = vperm.xlu1 %758, %v951_v31  }
  0xae   :  { %v1023_v56 = vpop.permute.xlu0 %110 }
  0xb0   :  { %v1025_v57 = vpop.permute.xlu1 %80 }
  0xb1   :  { %760 = vset.pattern.permute.xlu1 %v774_v0 }
  0xb2   :  { %394 = vperm.xlu1 %760, %v887_v19   ;;  %v1029_v58 = vpop.permute.xlu0 %205 }
  0xb5   :  { %v363_v60 = vpop.permute.xlu1 %362 }
  0xb6   :  { %761 = vset.pattern.permute.xlu1 %v775_v1  ;;  %v1035_v61 = vpop.permute.xlu0 %220  ;;  %v420_v18 = vmul.f32 %v1064_v22, %v363_v60 }
  0xb7   :  { %215 = vperm.xlu1 %761, %v49_v59  }
  0xba   :  { %v1037_v62 = vpop.permute.xlu1 %175  ;;  %v1039_v63 = vpop.permute.xlu0 %130 }
  0xbb   :  { %762 = vset.pattern.permute.xlu1 %v776_v8 }
  0xbc   :  { %298 = vperm.xlu1 %762, %v1012_v52  }
  0xbe   :  { %v1043_v3 = vpop.permute.xlu0 %225 }
  0xbf   :  { %v1045_v4 = vpop.permute.xlu1 %266 }
  0xc0   :  { %302 = vperm.xlu1 %762, %v951_v31  }
  0xc3   :  { %v251_v7 = vpop.permute.xlu0 %250  ;;  %v1048_v9 = vpop.permute.xlu1 %270 }
  0xc4   :  { %763 = vset.pattern.permute.xlu1 %v777_v16  ;;  %v317_v20 = vmul.f32 %v1059_v17, %v251_v7  ;;  %v322_v2 = vmul.f32 %v1059_v17, %v1048_v9 }
  0xc5   :  { %494 = vperm.xlu1 %763, %v887_v19  }
  0xc6   :  { %v333_v59 = vadd.f32 %v317_v20, %v233_v27  ;;  %v235_v20 = vadd.f32 %v996_v46, %v139_v35 }
  0xc7   :  { %v259_v13 = vpop.permute.xlu0 %258 }
  0xc8   :  { %v463_v14 = vpop.permute.xlu1 %462  ;;  %v433_v10 = vadd.f32 %v417_v41, %v333_v59  ;;  %v319_v15 = vmul.f32 %v1059_v17, %v259_v13 }
  0xc9   :  { %764 = vset.pattern.permute.xlu1 %v775_v1 }
  0xca   :  { %125 = vperm.xlu1 %764, %v924_v26   ;;  %v533_v27 = vadd.f32 %v517_v40, %v433_v10 }
  0xcb   :  { %v275_v19 = vpop.permute.xlu0 %274 }
  0xcc   :  { %v323_v24 = vmul.f32 %v1059_v17, %v275_v19  ;;  %v334_v19 = vadd.f32 %v318_v36, %v234_v33  ;;  %v549_v59 = vmax.f32 %v533_v27, 0.0 }
  0xcd   :  { %v86_v21 = vpop.permute.xlu1 %85 }
  0xce   :  { %v143_v25 = vmul.f32 %v1055_v12, %v86_v21  ;;  %765 = vset.pattern.permute.xlu1 %v774_v0  ;;  %v520_v21 = vmul.f32 %v1082_v5, %v463_v14  ;;  %v434_v47 = vadd.f32 %v418_v42, %v334_v19 }
  0xcf   :  { %398 = vperm.xlu1 %765, %v1012_v52   ;;  %v1073_v32 = vpop.permute.xlu0 %290 }
  0xd0   :  { %v239_v44 = vadd.f32 %v186_v51, %v143_v25  ;;  %v320_v51 = vmul.f32 %v1059_v17, %v1004_v49  ;;  %v335_v25 = vadd.f32 %v319_v15, %v235_v20 }
  0xd2   :  { %v339_v6 = vadd.f32 %v323_v24, %v239_v44  ;;  %v367_v7 = vpop.permute.xlu1 %366  ;;  %v336_v13 = vadd.f32 %v320_v51, %v236_v38  ;;  %v435_v14 = vadd.f32 %v419_v45, %v335_v25  ;;  %v144_v25 = vmul.f32 %v1055_v12, %v1006_v50 }
  0xd3   :  { %402 = vperm.xlu1 %765, %v951_v31   ;;  %v1085_v11 = vpop.permute.xlu0 %306  ;;  %v52_v31 = vld [vmem:[%s1202_s2 + $0x78] sm:$0xff] }
  0xd4   :  { %v1091_v43 = vadd.f32 %v423_v39, %v339_v6  ;;  %v436_v29 = vadd.f32 %v420_v18, %v336_v13  ;;  %v141_v6 = vmul.f32 %v1055_v12, %v1020_v55  ;;  %v421_v55 = vmul.f32 %v1064_v22, %v367_v7 }
  0xd6   :  { %v371_v49 = vpop.permute.xlu1 %370  ;;  %v536_v53 = vadd.f32 %v520_v21, %v436_v29  ;;  %v237_v42 = vadd.f32 %v1037_v62, %v141_v6  ;;  %v327_v6 = vmul.f32 %v1059_v17, %v1073_v32 }
  0xd7   :  { %767 = vset.pattern.permute.xlu1 %v775_v1  ;;  %v142_v1 = vmul.f32 %v1055_v12, %v1025_v57  ;;  %v422_v36 = vmul.f32 %v1064_v22, %v371_v49 }
  0xd8   :  { %v455_v24 = vpop.permute.xlu0 %454  ;;  %230 = vperm.xlu1 %767, %v52_v31   ;;  %v552_v10 = vmax.f32 %v536_v53, 0.0 }
  0xd9   :  { %v518_v60 = vmul.f32 %v1082_v5, %v455_v24  ;;  %v238_v57 = vadd.f32 %v1001_v48, %v142_v1  ;;  %v780_v24 = vmov 0.0  }
  0xda   :  { %696 = vmatprep.mubr.msk.f32.mxu0 %vm779_vm0, %v780_v24 }
  0xdb   :  { %v534_v46 = vadd.f32 %v518_v60, %v434_v47  ;;  %v1111_v30 = vpop.permute.xlu1 %190  ;;  %v338_v9 = vadd.f32 %v322_v2, %v238_v57  ;;  %v427_v57 = vmul.f32 %v1064_v22, %v973_v37 }
  0xdc   :  { %v459_v39 = vpop.permute.xlu0 %458  ;;  %769 = vset.pattern.permute.xlu1 %v776_v8  ;;  %v321_v8 = vmul.f32 %v1059_v17, %v1045_v4 }
  0xdd   :  { %v550_v34 = vmax.f32 %v534_v46, 0.0  ;;  %v519_v44 = vmul.f32 %v1082_v5, %v459_v39  ;;  %310 = vperm.xlu1 %769, %v903_v23   ;;  %v438_v38 = vadd.f32 %v422_v36, %v338_v9 }
  0xde   :  { %v337_v4 = vadd.f32 %v321_v8, %v237_v42 }
  0xdf   :  { %v535_v33 = vadd.f32 %v519_v44, %v435_v14  ;;  %v700_v41 = vpack.c.bf16 %v550_v34, %v549_v59 }
  0xe0   :  { %v471_v51 = vpop.permute.xlu0 %470  ;;  %v279_v35 = vpop.permute.xlu1 %278  ;;  %v437_v62 = vadd.f32 %v421_v55, %v337_v4 }
  0xe1   :  { %v551_v15 = vmax.f32 %v535_v33, 0.0  ;;  %770 = vset.pattern.permute.xlu1 %v777_v16  ;;  %701 = vmatpush3.bf16.msra.mxu0 %v700_v41  ;;  %v522_v31 = vmul.f32 %v1082_v5, %v471_v51 }
  0xe2   :  { %498 = vperm.xlu1 %770, %v1012_v52   ;;  %702 = vmatprep.subr.bf16.mxu0 %v778_v28 }
  0xe3   :  { %v703_v48 = vpack.c.bf16 %v552_v10, %v551_v15  ;;  %v538_v49 = vadd.f32 %v522_v31, %v438_v38 }
  0xe4   :  { %v475_v60 = vpop.permute.xlu0 %474 }
  0xe5   :  { %v467_v18 = vpop.permute.xlu1 %466  ;;  %704 = vmatpush3.bf16.msra.mxu0 %v703_v48  ;;  %v554_v20 = vmax.f32 %v538_v49, 0.0  ;;  %v523_v29 = vmul.f32 %v1082_v5, %v475_v60 }
  0xe6   :  { %v521_v19 = vmul.f32 %v1082_v5, %v467_v18  ;;  %771 = vset.pattern.permute.xlu1 %v774_v0  ;;  %705 = vmatprep.subr.bf16.mxu0 %v778_v28 }
  0xe7   :  { %406 = vperm.xlu1 %771, %v924_v26   ;;  %v566_v26 = vld [vmem:[%s1205_s4] sm:$0x3]  ;;  %v539_v39 = vadd.f32 %v523_v29, %v1091_v43 }
  0xe8   :  { %v537_v7 = vadd.f32 %v521_v19, %v437_v62  ;;  %569 = vperm.xlu0 %773, %v566_v26   ;;  %v487_v31 = vpop.permute.xlu0 %486 }
  0xe9   :  { %v555_v59 = vmax.f32 %v539_v39, 0.0  ;;  %v526_v4 = vmul.f32 %v1082_v5, %v487_v31 }
  0xea   :  { %v553_v52 = vmax.f32 %v537_v7, 0.0  ;;  %v96_v40 = vpop.permute.xlu1 %95 }
  0xeb   :  { %410 = vperm.xlu1 %771, %v903_v23  }
  0xec   :  { %v706_v45 = vpack.c.bf16 %v554_v20, %v553_v52 }
  0xee   :  { %v101_v13 = vpop.permute.xlu1 %100  ;;  %707 = vmatpush3.bf16.msra.mxu0 %v706_v45 }
  0xef   :  { %772 = vset.pattern.permute.xlu1 %v777_v16  ;;  %708 = vmatprep.subr.bf16.mxu0 %v778_v28  ;;  %v324_v16 = vmul.f32 %v1059_v17, %v279_v35  ;;  %v146_v35 = vmul.f32 %v1055_v12, %v101_v13 }
  0xf0   :  { %510 = vperm.xlu1 %772, %v903_v23   ;;  %v240_v23 = vadd.f32 %v1111_v30, %v144_v25  ;;  %v148_v25 = vmul.f32 %v1055_v12, %v1023_v56 }
  0xf1   :  { %v242_v10 = vadd.f32 %v1018_v54, %v146_v35 }
  0xf2   :  { %v340_v1 = vadd.f32 %v324_v16, %v240_v23 }
  0xf3   :  { %v379_v0 = vpop.permute.xlu1 %378 }
  0xf4   :  { %v424_v46 = vmul.f32 %v1064_v22, %v379_v0 }
  0xf6   :  { %v440_v34 = vadd.f32 %v424_v46, %v340_v1 }
  0xf8   :  { %v196_v21 = vpop.permute.xlu1 %195 }
  0xfd   :  { %v283_v47 = vpop.permute.xlu1 %282 }
  0xfe   :  { %v325_v9 = vmul.f32 %v1059_v17, %v283_v47  ;;  %v491_v47 = vpop.permute.xlu0 %490 }
 0x101   :  { %v287_v27 = vpop.permute.xlu1 %286 }
 0x102   :  { %v326_v32 = vmul.f32 %v1059_v17, %v287_v27  ;;  %v527_v27 = vmul.f32 %v1082_v5, %v491_v47 }
 0x104   :  { %v342_v37 = vadd.f32 %v326_v32, %v242_v10 }
 0x106   :  { %v479_v53 = vpop.permute.xlu1 %478 }
 0x107   :  { %v524_v14 = vmul.f32 %v1082_v5, %v479_v53 }
 0x109   :  { %v540_v44 = vadd.f32 %v524_v14, %v440_v34 }
 0x10b   :  { %v556_v50 = vmax.f32 %v540_v44, 0.0  ;;  %v106_v2 = vpop.permute.xlu1 %105 }
 0x10c   :  { %v147_v30 = vmul.f32 %v1055_v12, %v106_v2 }
 0x10d   :  { %v709_v33 = vpack.c.bf16 %v556_v50, %v555_v59 }
 0x10e   :  { %v243_v41 = vadd.f32 %v1029_v58, %v147_v30  ;;  %v145_v58 = vmul.f32 %v1055_v12, %v96_v40 }
 0x10f   :  { %710 = vmatpush3.bf16.msra.mxu0 %v709_v33 }
 0x110   :  { %v343_v43 = vadd.f32 %v327_v6, %v243_v41  ;;  %v383_v8 = vpop.permute.xlu1 %382  ;;  %711 = vmatprep.subr.bf16.mxu0 %v778_v28  ;;  %v241_v48 = vadd.f32 %v196_v21, %v145_v58 }
 0x111   :  { %v425_v38 = vmul.f32 %v1064_v22, %v383_v8 }
 0x112   :  { %v443_v36 = vadd.f32 %v427_v57, %v343_v43  ;;  %v341_v62 = vadd.f32 %v325_v9, %v241_v48 }
 0x114   :  { %v387_v51 = vpop.permute.xlu1 %386  ;;  %v441_v19 = vadd.f32 %v425_v38, %v341_v62  ;;  %v543_v53 = vadd.f32 %v527_v27, %v443_v36 }
 0x115   :  { %v426_v15 = vmul.f32 %v1064_v22, %v387_v51 }
 0x116   :  { %v559_v44 = vmax.f32 %v543_v53, 0.0 }
 0x117   :  { %v442_v18 = vadd.f32 %v426_v15, %v342_v37 }
 0x119   :  { %v211_v42 = vpop.permute.xlu1 %210  ;;  %v542_v7 = vadd.f32 %v526_v4, %v442_v18 }
 0x11a   :  { %v244_v23 = vadd.f32 %v211_v42, %v148_v25  ;;  %v503_v42 = vpop.permute.xlu0 %502 }
 0x11b   :  { %v558_v52 = vmax.f32 %v542_v7, 0.0  ;;  %v530_v15 = vmul.f32 %v1082_v5, %v503_v42 }
 0x11e   :  { %v295_v55 = vpop.permute.xlu1 %294 }
 0x11f   :  { %v328_v60 = vmul.f32 %v1059_v17, %v295_v55 }
 0x121   :  { %v344_v46 = vadd.f32 %v328_v60, %v244_v23 }
 0x123   :  { %v483_v49 = vpop.permute.xlu1 %482 }
 0x124   :  { %v525_v54 = vmul.f32 %v1082_v5, %v483_v49 }
 0x126   :  { %v541_v20 = vadd.f32 %v525_v54, %v441_v19  ;;  %v331_v19 = vmul.f32 %v1059_v17, %v1085_v11 }
 0x128   :  { %v557_v40 = vmax.f32 %v541_v20, 0.0  ;;  %v116_v45 = vpop.permute.xlu1 %115  ;;  %v152_v20 = vmul.f32 %v1055_v12, %v1039_v63 }
 0x129   :  { %v149_v8 = vmul.f32 %v1055_v12, %v116_v45 }
 0x12a   :  { %v712_v13 = vpack.c.bf16 %v558_v52, %v557_v40 }
 0x12c   :  { %v121_v0 = vpop.permute.xlu1 %120  ;;  %713 = vmatpush3.bf16.msra.mxu0 %v712_v13  ;;  %v507_v13 = vpop.permute.xlu0 %506 }
 0x12d   :  { %714 = vmatprep.subr.bf16.mxu0 %v778_v28  ;;  %v150_v30 = vmul.f32 %v1055_v12, %v121_v0  ;;  %v531_v11 = vmul.f32 %v1082_v5, %v507_v13 }
 0x12f   :  { %v246_v57 = vadd.f32 %v1035_v61, %v150_v30 }
 0x131   :  { %v395_v21 = vpop.permute.xlu1 %394 }
 0x132   :  { %v428_v29 = vmul.f32 %v1064_v22, %v395_v21 }
 0x134   :  { %v444_v39 = vadd.f32 %v428_v29, %v344_v46 }
 0x136   :  { %v216_v24 = vpop.permute.xlu1 %215 }
 0x137   :  { %v245_v32 = vadd.f32 %v216_v24, %v149_v8 }
 0x13b   :  { %v299_v26 = vpop.permute.xlu1 %298 }
 0x13c   :  { %v329_v36 = vmul.f32 %v1059_v17, %v299_v26 }
 0x13e   :  { %v345_v9 = vadd.f32 %v329_v36, %v245_v32 }
 0x13f   :  { %v303_v16 = vpop.permute.xlu1 %302 }
 0x140   :  { %v330_v41 = vmul.f32 %v1059_v17, %v303_v16 }
 0x142   :  { %v346_v51 = vadd.f32 %v330_v41, %v246_v57 }
 0x144   :  { %v495_v1 = vpop.permute.xlu1 %494 }
 0x145   :  { %v528_v34 = vmul.f32 %v1082_v5, %v495_v1 }
 0x147   :  { %v544_v14 = vadd.f32 %v528_v34, %v444_v39 }
 0x149   :  { %v560_v59 = vmax.f32 %v544_v14, 0.0  ;;  %v126_v50 = vpop.permute.xlu1 %125 }
 0x14a   :  { %v151_v55 = vmul.f32 %v1055_v12, %v126_v50 }
 0x14b   :  { %v715_v2 = vpack.c.bf16 %v560_v59, %v559_v44 }
 0x14c   :  { %v247_v38 = vadd.f32 %v1043_v3, %v151_v55 }
 0x14d   :  { %716 = vmatpush3.bf16.msra.mxu0 %v715_v2 }
 0x14e   :  { %v399_v56 = vpop.permute.xlu1 %398  ;;  %717 = vmatprep.subr.bf16.mxu0 %v778_v28  ;;  %v347_v40 = vadd.f32 %v331_v19, %v247_v38 }
 0x14f   :  { %v429_v10 = vmul.f32 %v1064_v22, %v399_v56 }
 0x151   :  { %v445_v61 = vadd.f32 %v429_v10, %v345_v9 }
 0x152   :  { %v403_v6 = vpop.permute.xlu1 %402 }
 0x153   :  { %v430_v43 = vmul.f32 %v1064_v22, %v403_v6 }
 0x155   :  { %v446_v58 = vadd.f32 %v430_v43, %v346_v51 }
 0x157   :  { %v231_v33 = vpop.permute.xlu1 %230  ;;  %v546_v31 = vadd.f32 %v530_v15, %v446_v58 }
 0x158   :  { %v248_v3 = vadd.f32 %v231_v33, %v152_v20 }
 0x159   :  { %v562_v18 = vmax.f32 %v546_v31, 0.0 }
 0x15c   :  { %v311_v35 = vpop.permute.xlu1 %310 }
 0x15d   :  { %v332_v52 = vmul.f32 %v1059_v17, %v311_v35 }
 0x15f   :  { %v348_v24 = vadd.f32 %v332_v52, %v248_v3 }
 0x161   :  { %v499_v37 = vpop.permute.xlu1 %498 }
 0x162   :  { %v529_v48 = vmul.f32 %v1082_v5, %v499_v37 }
 0x164   :  { %v545_v4 = vadd.f32 %v529_v48, %v445_v61 }
 0x166   :  { %v561_v62 = vmax.f32 %v545_v4, 0.0  ;;  %v407_v49 = vpop.permute.xlu1 %406 }
 0x167   :  { %v431_v7 = vmul.f32 %v1064_v22, %v407_v49  ;;  %v570_v27 = vpop.permute.xlu0 %569 }
 0x168   :  { %v718_v54 = vpack.c.bf16 %v562_v18, %v561_v62 }
 0x169   :  { %v447_v0 = vadd.f32 %v431_v7, %v347_v40 }
 0x16a   :  { %v411_v45 = vpop.permute.xlu1 %410  ;;  %719 = vmatpush3.bf16.msra.mxu0 %v718_v54 }
 0x16b   :  { %720 = vmatprep.subr.bf16.mxu0 %v778_v28  ;;  %v432_v21 = vmul.f32 %v1064_v22, %v411_v45  ;;  %v547_v47 = vadd.f32 %v531_v11, %v447_v0  ;;  %v565_v28 = vld [vmem:[%s1206_s3] sm:$0x3] }
 0x16d   :  { %v448_v25 = vadd.f32 %v432_v21, %v348_v24  ;;  %v563_v17 = vmax.f32 %v547_v47, 0.0 }
 0x16f   :  { %v511_v26 = vpop.permute.xlu1 %510 }
 0x170   :  { %v532_v63 = vmul.f32 %v1082_v5, %v511_v26 }
 0x172   :  { %v548_v12 = vadd.f32 %v532_v63, %v448_v25 }
 0x174   :  { %v564_v60 = vmax.f32 %v548_v12, 0.0 }
 0x176   :  { %v721_v16 = vpack.c.bf16 %v564_v60, %v563_v17 }
 0x178   :  { %722 = vmatpush3.bf16.msra.mxu0 %v721_v16 }
 0x17b   :  { %697 = vmatmul.mubr.f32.vlgmr.msra.gmra.mrb[0].mxu0 %v565_v28 }
 0x24e   :  { %v638_v22 = vpop.f32.mrb[0].mxu0 }
 0x24f   :  { %v639_v23 = vadd.f32 %v638_v22, %v570_v27  ;;  %v698_v29 = vpop.f32.mrb[1].mxu0 }
 0x251   :  { %642 = vst [vmem:[%s1207_s5] sm:$0x3] %v639_v23 }

</bundles_post_ra>
